<compile_context>
chip_gen: v6e
topology: v6e:2x2x1
jax: 0.10.0
libtpu: 0.0.40
codegen_flags: <defaults>
</compile_context>

<pallas_src>
import functools

import jax
import jax.numpy as jnp
from jax.experimental import pallas as pl
from jax.experimental.pallas import tpu as pltpu


def _channel_attention_kernel(x_ref, w1t_ref, w2t_ref, o_ref,
                              max_acc, sum_acc, *, nb, hw):
    # x_ref:   (nb, C, THW)   one (batch-tile, spatial-tile) block
    # w1t_ref: (C, Cr)        first 1x1 conv weight, transposed
    # w2t_ref: (Cr, C)        second 1x1 conv weight, transposed
    # o_ref:   (nb, 1, C)     sigmoid(attn) for this batch tile (resident over k)
    # max_acc/sum_acc: (nb, C) f32 running reductions over spatial tiles
    k = pl.program_id(1)

    @pl.when(k == 0)
    def _init():
        max_acc[...] = jnp.full_like(max_acc, -jnp.inf)
        sum_acc[...] = jnp.zeros_like(sum_acc)

    # Single pass over the tile: fused running max + running sum, f32 accumulation
    # (safe even if the input ever arrives as bf16).
    x = x_ref[...].astype(jnp.float32)                      # (nb, C, THW)
    max_acc[...] = jnp.maximum(max_acc[...], jnp.max(x, axis=2))
    sum_acc[...] = sum_acc[...] + jnp.sum(x, axis=2)

    @pl.when(k == pl.num_programs(1) - 1)
    def _finalize():
        avg = sum_acc[...] * (1.0 / float(hw))              # (nb, C) true mean
        # Batched shared MLP: both pooled vectors for all nb rows in one matmul.
        pooled = jnp.concatenate([max_acc[...], avg], axis=0)          # (2*nb, C)
        h = jnp.dot(pooled, w1t_ref[...],
                    preferred_element_type=jnp.float32)                # (2*nb, Cr)
        h = jnp.maximum(h, 0.0)                                        # ReLU
        out = jnp.dot(h, w2t_ref[...],
                      preferred_element_type=jnp.float32)              # (2*nb, C)
        s = out[:nb, :] + out[nb:, :]                                  # (nb, C)
        sig = 1.0 / (1.0 + jnp.exp(-s))                                # sigmoid
        o_ref[...] = sig.reshape(o_ref.shape).astype(o_ref.dtype)


def _choose_tiles(n, c, hw, itemsize,
                  target_block_bytes=2 << 20, max_block_bytes=4 << 20):
    """Pick (nb, thw) so one input block is ~1-4 MB and shapes stay TPU-legal."""
    # Spatial tile: a multiple of 128 that divides HW, else the full HW.
    thw = hw
    if hw % 128 == 0:
        while (thw % 256 == 0) and c * thw * itemsize > target_block_bytes:
            thw //= 2
    # Batch tile: largest divisor of N keeping the input block under budget.
    nb = 1
    for d in range(n, 0, -1):
        if n % d == 0 and d * c * thw * itemsize <= max_block_bytes:
            nb = d
            break
    return nb, thw


def channel_attention(x, w1, w2, *, nb=None, thw=None):
    """x: (N, C, H, W); w1: (Cr, C, 1, 1); w2: (C, Cr, 1, 1) -> (N, C, 1, 1)."""
    N, C, H, W = x.shape
    Cr = w1.shape[0]
    HW = H * W
    itemsize = jnp.dtype(x.dtype).itemsize

    auto_nb, auto_thw = _choose_tiles(N, C, HW, itemsize)
    if nb is None:
        nb = auto_nb
    if thw is None:
        thw = auto_thw
    assert N % nb == 0 and HW % thw == 0, "tile sizes must divide N / H*W"

    x3 = x.reshape(N, C, HW)
    w1t = w1.reshape(Cr, C).T      # (C, Cr)
    w2t = w2.reshape(C, Cr).T      # (Cr, C)

    grid = (N // nb, HW // thw)

    kernel = functools.partial(_channel_attention_kernel, nb=nb, hw=HW)

    cost = pl.CostEstimate(
        flops=int(2 * N * C * HW + 8 * N * C * Cr),
        transcendentals=int(N * C),
        bytes_accessed=int(N * C * HW * itemsize + 2 * C * Cr * 4
                           + N * C * itemsize),
    )

    out = pl.pallas_call(
        kernel,
        out_shape=jax.ShapeDtypeStruct((N, 1, C), x.dtype),
        grid=grid,
        in_specs=[
            pl.BlockSpec((nb, C, thw), lambda b, k: (b, 0, k)),
            pl.BlockSpec((C, Cr), lambda b, k: (0, 0)),
            pl.BlockSpec((Cr, C), lambda b, k: (0, 0)),
        ],
        # Output block index is constant across k -> resident; written only on
        # the last k step (one lane-dense store per batch-tile).
        out_specs=pl.BlockSpec((nb, 1, C), lambda b, k: (b, 0, 0)),
        scratch_shapes=[
            pltpu.VMEM((nb, C), jnp.float32),   # running max
            pltpu.VMEM((nb, C), jnp.float32),   # running sum
        ],
        compiler_params=pltpu.CompilerParams(
            dimension_semantics=("parallel", "arbitrary"),
            vmem_limit_bytes=32 * 1024 * 1024,
        ),
        cost_estimate=cost,
    )(x3, w1t, w2t)

    return out.reshape(N, C, 1, 1)


def channel_attention_ref(x, w1, w2):
    """Pure-JAX reference matching the PyTorch module."""
    N, C, H, W = x.shape
    Cr = w1.shape[0]
    max_p = jnp.max(x, axis=(2, 3))          # (N, C)
    avg_p = jnp.mean(x, axis=(2, 3))         # (N, C)
    w1m = w1.reshape(Cr, C)
    w2m = w2.reshape(C, Cr)

    def mlp(p):
        h = jnp.maximum(p @ w1m.T, 0.0)      # (N, Cr)
        return h @ w2m.T                     # (N, C)

    s = mlp(max_p) + mlp(avg_p)
    return jax.nn.sigmoid(s).reshape(N, C, 1, 1)


if __name__ == "__main__":
    num_channels = 32
    reduction = 4                 # hidden = 32 // 4 = 8
    hidden = num_channels // reduction
    N, H, W = 2, 16, 16

    key = jax.random.PRNGKey(0)
    kx, k1, k2 = jax.random.split(key, 3)
    x = jax.random.normal(kx, (N, num_channels, H, W), dtype=jnp.float32)
    # Conv2d(num_channels, hidden, 1, bias=False) -> weight (hidden, C, 1, 1)
    w1 = (jax.random.normal(k1, (hidden, num_channels, 1, 1), dtype=jnp.float32)
          * (1.0 / jnp.sqrt(num_channels)))
    # Conv2d(hidden, num_channels, 1, bias=False) -> weight (C, hidden, 1, 1)
    w2 = (jax.random.normal(k2, (num_channels, hidden, 1, 1), dtype=jnp.float32)
          * (1.0 / jnp.sqrt(hidden)))

    ref = channel_attention_ref(x, w1, w2)

    # Auto-tiled config (single big block for these small shapes).
    out = jax.block_until_ready(channel_attention(x, w1, w2))
    assert out.shape == (N, num_channels, 1, 1)
    assert jnp.allclose(out, ref, atol=1e-5, rtol=1e-5), "mismatch vs reference"

    # Force the multi-step reduction path (nb=1, two spatial tiles) to exercise
    # the scratch-accumulator init/finalize logic.
    out_tiled = jax.block_until_ready(channel_attention(x, w1, w2, nb=1, thw=128))
    assert jnp.allclose(out_tiled, ref, atol=1e-5, rtol=1e-5), "tiled mismatch"

    print("KERNEL_OK")
</pallas_src>

<mosaic_0001>
module attributes {stable_mosaic.version = 11 : i64} {
  func.func @_channel_attention_kernel(%arg0: i32, %arg1: i32, %arg2: memref<2x32x256xf32, #tpu.memory_space<vmem>>, %arg3: memref<32x8xf32, #tpu.memory_space<vmem>>, %arg4: memref<8x32xf32, #tpu.memory_space<vmem>>, %arg5: memref<2x1x32xf32, #tpu.memory_space<vmem>>, %arg6: memref<2x32xf32, #tpu.memory_space<vmem>>, %arg7: memref<2x32xf32, #tpu.memory_space<vmem>>) attributes {dimension_semantics = [#tpu.dimension_semantics<parallel>, #tpu.dimension_semantics<arbitrary>], iteration_bounds = array<i64: 1, 1>, scalar_prefetch = 0 : i64, scratch_operands = 2 : i64, tpu.core_type = #tpu.core_type<tc>, window_params = [{transform_indices = @transform_0, window_bounds = array<i64: 2, 32, 256>}, {pipeline_mode = #tpu.pipeline_mode<synchronous>, transform_indices = @transform_1, window_bounds = array<i64: 32, 8>}, {pipeline_mode = #tpu.pipeline_mode<synchronous>, transform_indices = @transform_2, window_bounds = array<i64: 8, 32>}, {transform_indices = @transform_3, window_bounds = array<i64: 2, 1, 32>}]} {
    %c0_i32 = arith.constant 0 : i32
    %0 = arith.cmpi eq, %arg1, %c0_i32 : i32
    %1 = arith.extui %0 : i1 to i32
    %c0_i32_0 = arith.constant 0 : i32
    %2 = arith.cmpi ne, %1, %c0_i32_0 : i32
    scf.if %2 {
      %cst_14 = arith.constant 0xFF800000 : f32
      %15 = vector.broadcast %cst_14 : f32 to vector<2x32xf32>
      %c0_15 = arith.constant 0 : index
      %c0_16 = arith.constant 0 : index
      %16 = vector.load %arg6[%c0_15, %c0_16] : memref<2x32xf32, #tpu.memory_space<vmem>>, vector<2x32xf32>
      tpu.vector_store %arg6[%c0_15, %c0_16], %15 {strides = array<i32>} : memref<2x32xf32, #tpu.memory_space<vmem>>, vector<2x32xf32>,
      %cst_17 = arith.constant 0.000000e+00 : f32
      %17 = vector.broadcast %cst_17 : f32 to vector<2x32xf32>
      %c0_18 = arith.constant 0 : index
      %c0_19 = arith.constant 0 : index
      %18 = vector.load %arg7[%c0_18, %c0_19] : memref<2x32xf32, #tpu.memory_space<vmem>>, vector<2x32xf32>
      tpu.vector_store %arg7[%c0_18, %c0_19], %17 {strides = array<i32>} : memref<2x32xf32, #tpu.memory_space<vmem>>, vector<2x32xf32>,
    } else {
    }
    %c0 = arith.constant 0 : index
    %c0_1 = arith.constant 0 : index
    %c0_2 = arith.constant 0 : index
    %3 = vector.load %arg2[%c0, %c0_1, %c0_2] : memref<2x32x256xf32, #tpu.memory_space<vmem>>, vector<2x32x256xf32>
    %c0_3 = arith.constant 0 : index
    %c0_4 = arith.constant 0 : index
    %4 = vector.load %arg6[%c0_3, %c0_4] : memref<2x32xf32, #tpu.memory_space<vmem>>, vector<2x32xf32>
    %cst = arith.constant dense<0xFF800000> : vector<2x32xf32>
    %5 = vector.multi_reduction <maximumf>, %3, %cst [2] : vector<2x32x256xf32> to vector<2x32xf32>
    %6 = arith.maximumf %4, %5 : vector<2x32xf32>
    %c0_5 = arith.constant 0 : index
    %c0_6 = arith.constant 0 : index
    %7 = vector.load %arg6[%c0_5, %c0_6] : memref<2x32xf32, #tpu.memory_space<vmem>>, vector<2x32xf32>
    tpu.vector_store %arg6[%c0_5, %c0_6], %6 {strides = array<i32>} : memref<2x32xf32, #tpu.memory_space<vmem>>, vector<2x32xf32>,
    %c0_7 = arith.constant 0 : index
    %c0_8 = arith.constant 0 : index
    %8 = vector.load %arg7[%c0_7, %c0_8] : memref<2x32xf32, #tpu.memory_space<vmem>>, vector<2x32xf32>
    %cst_9 = arith.constant dense<0.000000e+00> : vector<2x32xf32>
    %9 = vector.multi_reduction <add>, %3, %cst_9 [2] : vector<2x32x256xf32> to vector<2x32xf32>
    %10 = arith.addf %8, %9 : vector<2x32xf32>
    %c0_10 = arith.constant 0 : index
    %c0_11 = arith.constant 0 : index
    %11 = vector.load %arg7[%c0_10, %c0_11] : memref<2x32xf32, #tpu.memory_space<vmem>>, vector<2x32xf32>
    tpu.vector_store %arg7[%c0_10, %c0_11], %10 {strides = array<i32>} : memref<2x32xf32, #tpu.memory_space<vmem>>, vector<2x32xf32>,
    %c0_i32_12 = arith.constant 0 : i32
    %12 = arith.cmpi eq, %arg1, %c0_i32_12 : i32
    %13 = arith.extui %12 : i1 to i32
    %c0_i32_13 = arith.constant 0 : i32
    %14 = arith.cmpi ne, %13, %c0_i32_13 : i32
    scf.if %14 {
      %c0_14 = arith.constant 0 : index
      %c0_15 = arith.constant 0 : index
      %15 = vector.load %arg7[%c0_14, %c0_15] : memref<2x32xf32, #tpu.memory_space<vmem>>, vector<2x32xf32>
      %cst_16 = arith.constant 3.906250e-03 : f32
      %16 = vector.broadcast %cst_16 : f32 to vector<2x32xf32>
      %17 = arith.mulf %15, %16 : vector<2x32xf32>
      %c0_17 = arith.constant 0 : index
      %c0_18 = arith.constant 0 : index
      %18 = vector.load %arg6[%c0_17, %c0_18] : memref<2x32xf32, #tpu.memory_space<vmem>>, vector<2x32xf32>
      %19 = tpu.concatenate %18, %17 in 0 : vector<2x32xf32>, vector<2x32xf32> -> vector<4x32xf32>
      %c0_19 = arith.constant 0 : index
      %c0_20 = arith.constant 0 : index
      %20 = vector.load %arg3[%c0_19, %c0_20] : memref<32x8xf32, #tpu.memory_space<vmem>>, vector<32x8xf32>
      %cst_21 = arith.constant dense<0.000000e+00> : vector<4x8xf32>
      %21 = tpu.matmul %19, %20, %cst_21 {dimension_numbers = #tpu.dot_dimension_numbers<[1], [0], [0], [1], [0, 0, 1, 1], [], []>} : vector<4x32xf32>, vector<32x8xf32>, vector<4x8xf32> -> vector<4x8xf32>
      %cst_22 = arith.constant 0.000000e+00 : f32
      %22 = vector.broadcast %cst_22 : f32 to vector<4x8xf32>
      %23 = arith.maximumf %21, %22 : vector<4x8xf32>
      %c0_23 = arith.constant 0 : index
      %c0_24 = arith.constant 0 : index
      %24 = vector.load %arg4[%c0_23, %c0_24] : memref<8x32xf32, #tpu.memory_space<vmem>>, vector<8x32xf32>
      %cst_25 = arith.constant dense<0.000000e+00> : vector<4x32xf32>
      %25 = tpu.matmul %23, %24, %cst_25 {dimension_numbers = #tpu.dot_dimension_numbers<[1], [0], [0], [1], [0, 0, 1, 1], [], []>} : vector<4x8xf32>, vector<8x32xf32>, vector<4x32xf32> -> vector<4x32xf32>
      %26 = vector.extract_strided_slice %25 {offsets = [0, 0], sizes = [2, 32], strides = [1, 1]} : vector<4x32xf32> to vector<2x32xf32>
      %27 = vector.extract_strided_slice %25 {offsets = [2, 0], sizes = [2, 32], strides = [1, 1]} : vector<4x32xf32> to vector<2x32xf32>
      %28 = arith.addf %26, %27 : vector<2x32xf32>
      %cst_26 = arith.constant 0.000000e+00 : f32
      %29 = vector.broadcast %cst_26 : f32 to vector<2x32xf32>
      %30 = arith.subf %29, %28 : vector<2x32xf32>
      %31 = math.exp %30 : vector<2x32xf32>
      %cst_27 = arith.constant 1.000000e+00 : f32
      %32 = vector.broadcast %cst_27 : f32 to vector<2x32xf32>
      %33 = arith.addf %32, %31 : vector<2x32xf32>
      %cst_28 = arith.constant 1.000000e+00 : f32
      %34 = vector.broadcast %cst_28 : f32 to vector<2x32xf32>
      %35 = arith.divf %34, %33 : vector<2x32xf32>
      %36 = vector.shape_cast %35 : vector<2x32xf32> to vector<2x1x32xf32>
      %c0_29 = arith.constant 0 : index
      %c0_30 = arith.constant 0 : index
      %c0_31 = arith.constant 0 : index
      %37 = vector.load %arg5[%c0_29, %c0_30, %c0_31] : memref<2x1x32xf32, #tpu.memory_space<vmem>>, vector<2x1x32xf32>
      tpu.vector_store %arg5[%c0_29, %c0_30, %c0_31], %36 {strides = array<i32>} : memref<2x1x32xf32, #tpu.memory_space<vmem>>, vector<2x1x32xf32>,
    } else {
    }
    return
  }
  func.func @transform_0(%arg0: i32, %arg1: i32) -> (i32, i32, i32) {
    %c0_i32 = arith.constant 0 : i32
    %c0_i32_0 = arith.constant 0 : i32
    return %arg0, %c0_i32, %arg1 : i32, i32, i32
  }
  func.func @transform_1(%arg0: i32, %arg1: i32) -> (i32, i32) {
    %c0_i32 = arith.constant 0 : i32
    %c0_i32_0 = arith.constant 0 : i32
    %c0_i32_1 = arith.constant 0 : i32
    return %c0_i32, %c0_i32_0 : i32, i32
  }
  func.func @transform_2(%arg0: i32, %arg1: i32) -> (i32, i32) {
    %c0_i32 = arith.constant 0 : i32
    %c0_i32_0 = arith.constant 0 : i32
    %c0_i32_1 = arith.constant 0 : i32
    return %c0_i32, %c0_i32_0 : i32, i32
  }
  func.func @transform_3(%arg0: i32, %arg1: i32) -> (i32, i32, i32) {
    %c0_i32 = arith.constant 0 : i32
    %c0_i32_0 = arith.constant 0 : i32
    %c0_i32_1 = arith.constant 0 : i32
    return %arg0, %c0_i32, %c0_i32_0 : i32, i32, i32
  }
}

</mosaic_0001>

<bundles_post_ra>
// kernel: tpu_custom_call.1
= control target key start
LH: loop header
LB: loop body
LE: loop exit
PB: predicated region body
PF: predicated region fallthrough
CT: control target
= control target key end

     0   :  { %8 = vsyncpa [#allocation5], 0  ;;  %s592_s0 = inlined_call_operand.hbm [shape: f32[2,32,256], index: 0, kind: input, shape index: {}]   ;;  %s593_s1 = inlined_call_operand.vmem [shape: f32[32,8], index: 1, kind: input, shape index: {}]   ;;  %s594_s2 = inlined_call_operand.vmem [shape: f32[8,32], index: 2, kind: input, shape index: {}]   ;;  %s595_s3 = inlined_call_operand.hbm [shape: f32[2,1,32], index: 3, kind: output, shape index: {}]  }
   0x1   :  { %9 = vsyncpa [#allocation6], 0  ;;  %s514_s12 = smov [#allocation4]  }
   0x2   :  { %s15_s13 = sshll.u32 %s514_s12, 4  ;;  %s16_s13 = int_to_ptr.vmem [resolvable:$true] %s15_s13 }
   0x3   :  { %s478_s14 = scalar_lea.vmem %s16_s13, 2048  ;;  %p483_p1 = scmp.lt.s32.totalorder %s16_s13, %s16_s13 }
   0x4   :  { %p479_p0 = scmp.ne.s32.totalorder %s16_s13, %s478_s14  ;;  %p484_p2 = scmp.lt.s32.totalorder %s478_s14, %s478_s14 }
   0x6   :  { %p485_p3 = por %p484_p2, %p483_p1 }
   0x8   :  { %p486_p4 = pnand %p485_p3, %p479_p0 }
   0xa   :  { %489 = shalt.err (!%p486_p4)
}
   0xb   :  { %s515_s15 = smov 256   ;;  %s516_s16 = smov 16  }
   0xc   :  { %21 = dma.hbm_to_vmem [thread:$0]  %s592_s0, 2048, %s16_s13, [#allocation5], %s515_s15, %s515_s15, %s516_s16  }
   0xd   :  { %510 = dma.done.wait [#allocation5], 2048  }
   0xe   :  { %511 = vsyncadd [#allocation5], 4294965248  ;;  %v44_v0 = vld [vmem:[#allocation4 + $0x40] sm:$0xff]  ;;  %v45_v1 = vld [vmem:[#allocation4 + $0x48] sm:$0xff]  ;;  %vm33_vm0 = vcmask 254976   ;;  %v517_v28 = vmov 0.0   ;;  %v85_v38 = vlaneseq }
   0xf   :  { %v36_v2 = vld [vmem:[#allocation4] sm:$0xff]  ;;  %v150_v3 = vadd.f32 %v45_v1, %v44_v0  ;;  %v37_v4 = vld [vmem:[#allocation4 + $0x8] sm:$0xff]  ;;  %v46_v5 = vld [vmem:[#allocation4 + $0x50] sm:$0xff]  ;;  %v65_v27 = vmax.f32 %v44_v0, %v45_v1  ;;  %35 = vst.msk [vmem:[#allocation3] sm:$0x3] %vm33_vm0, %v517_v28  ;;  %441 = vmatprep.subr.mxu0 %v517_v28  ;;  %452 = vmatprep.subr.mxu1 %v517_v28  ;;  %v518_v33 = vmov -inf  }
  0x10   :  { %v47_v6 = vld [vmem:[#allocation4 + $0x58] sm:$0xff]  ;;  %v138_v7 = vadd.f32 %v37_v4, %v36_v2  ;;  %v38_v8 = vld [vmem:[#allocation4 + $0x10] sm:$0xff]  ;;  %v48_v12 = vld [vmem:[#allocation4 + $0x60] sm:$0xff]  ;;  %v53_v25 = vmax.f32 %v36_v2, %v37_v4  ;;  %34 = vst.msk [vmem:[#allocation2] sm:$0x3] %vm33_vm0, %v518_v33  ;;  %vm519_vm1 = vmmov 0  }
  0x11   :  { %v39_v9 = vld [vmem:[#allocation4 + $0x18] sm:$0xff]  ;;  %151 = vadd.xlane.f32.xlu1 %v150_v3  ;;  %v153_v10 = vadd.f32 %v47_v6, %v46_v5  ;;  %v49_v13 = vld [vmem:[#allocation4 + $0x68] sm:$0xff]  ;;  %v40_v14 = vld [vmem:[#allocation4 + $0x20] sm:$0xff]  ;;  %v68_v26 = vmax.f32 %v46_v5, %v47_v6  ;;  %449 = vmatprep.mubr.msk.f32.mxu0 %vm519_vm1, %v517_v28  ;;  %v86_v39 = vand.u32 127, %v85_v38  ;;  %v561_v44 = vshrl.u32 %v85_v38, 7 }
  0x12   :  { %139 = vadd.xlane.f32.xlu0 %v138_v7  ;;  %v141_v11 = vadd.f32 %v39_v9, %v38_v8  ;;  %v41_v15 = vld [vmem:[#allocation4 + $0x28] sm:$0xff]  ;;  %v156_v16 = vadd.f32 %v49_v13, %v48_v12  ;;  %v50_v18 = vld [vmem:[#allocation4 + $0x70] sm:$0xff]  ;;  %v51_v19 = vld [vmem:[#allocation4 + $0x78] sm:$0xff]  ;;  %v56_v24 = vmax.f32 %v38_v8, %v39_v9  ;;  %v71_v29 = vmax.f32 %v48_v12, %v49_v13 }
  0x13   :  { %v144_v17 = vadd.f32 %v41_v15, %v40_v14  ;;  %v42_v20 = vld [vmem:[#allocation4 + $0x30] sm:$0xff]  ;;  %v43_v21 = vld [vmem:[#allocation4 + $0x38] sm:$0xff]  ;;  %v159_v22 = vadd.f32 %v51_v19, %v50_v18  ;;  %v59_v30 = vmax.f32 %v40_v14, %v41_v15  ;;  %v74_v31 = vmax.f32 %v50_v18, %v51_v19  ;;  %v224_v36 = vld [vmem:[%s593_s1 + $0x8] sm:$0xff]  ;;  %454 = vmatprep.mubr.msk.f32.mxu1 %vm519_vm1, %v517_v28 }
  0x14   :  { %v147_v23 = vadd.f32 %v43_v21, %v42_v20  ;;  %v62_v32 = vmax.f32 %v42_v20, %v43_v21  ;;  %v226_v34 = vld [vmem:[%s593_s1 + $0x18] sm:$0xff]  ;;  %v225_v35 = vld [vmem:[%s593_s1 + $0x10] sm:$0xff]  ;;  %v223_v37 = vld [vmem:[%s593_s1] sm:$0xff]  ;;  %v91_v42 = vadd.s32 4294967288, %v86_v39  ;;  %v98_v43 = vadd.s32 4294967280, %v86_v39 }
  0x15   :  { %154 = vadd.xlane.f32.xlu1 %v153_v10  ;;  %442 = vmatpush3.msra.mxu0 %v226_v34  ;;  %v105_v48 = vadd.s32 4294967272, %v86_v39  ;;  %v89_v50 = vsub.s32 %v86_v39, %v561_v44  ;;  %vm96_vm2 = vcmask 130112   ;;  %vm103_vm3 = vcmask 195712   ;;  %v302_v39 = vld [vmem:[%s594_s2] sm:$0xff]  ;;  %s521_s2 = smov [#allocation7]  }
  0x16   :  { %142 = vadd.xlane.f32.xlu0 %v141_v11  ;;  %443 = vmatprep.subr.mxu0 %v517_v28  ;;  %v94_v46 = vsub.s32 %v91_v42, %v561_v44  ;;  %v101_v49 = vsub.s32 %v98_v43, %v561_v44  ;;  %vm110_vm4 = vcmask 261312   ;;  %vm131_vm5 = vcmask 1041409   ;;  %v137_v5 = vld [vmem:[#allocation3] sm:$0x3]  ;;  %s420_s27 = sshll.u32 %s521_s2, 4  ;;  %s421_s27 = int_to_ptr.vmem [resolvable:$true] %s420_s27 }
  0x17   :  { %444 = vmatpush3.msra.mxu0 %v225_v35  ;;  %v108_v54 = vsub.s32 %v105_v48, %v561_v44  ;;  %vm221_vm6 = vcmask 1041408   ;;  %vm227_vm7 = vcmask 261120   ;;  %453 = vmatpush3.msra.mxu1 %v302_v39  ;;  %vm303_vm8 = vcmask 64512   ;;  %s490_s28 = scalar_lea.vmem %s421_s27, 32  ;;  %p495_p6 = scmp.lt.s32.totalorder %s421_s27, %s421_s27 }
  0x18   :  { %445 = vmatprep.subr.mxu0 %v517_v28  ;;  %vm412_vm9 = vcmask 253952   ;;  %p491_p5 = scmp.ne.s32.totalorder %s421_s27, %s490_s28  ;;  %p496_p7 = scmp.lt.s32.totalorder %s490_s28, %s490_s28 }
  0x19   :  { %157 = vadd.xlane.f32.xlu1 %v156_v16  ;;  %446 = vmatpush3.msra.mxu0 %v224_v36 }
  0x1a   :  { %145 = vadd.xlane.f32.xlu0 %v144_v17  ;;  %447 = vmatprep.subr.mxu0 %v517_v28  ;;  %p497_p8 = por %p496_p7, %p495_p6 }
  0x1b   :  { %448 = vmatpush3.msra.mxu0 %v223_v37 }
  0x1c   :  { %p498_p9 = pnand %p497_p8, %p491_p5 }
  0x1d   :  { %160 = vadd.xlane.f32.xlu1 %v159_v22 }
  0x1e   :  { %148 = vadd.xlane.f32.xlu0 %v147_v23 }
  0x21   :  { %57 = vmax.xlane.f32.xlu1 %v56_v24 }
  0x22   :  { %54 = vmax.xlane.f32.xlu0 %v53_v25 }
  0x25   :  { %69 = vmax.xlane.f32.xlu1 %v68_v26 }
  0x26   :  { %66 = vmax.xlane.f32.xlu0 %v65_v27 }
  0x29   :  { %72 = vmax.xlane.f32.xlu1 %v71_v29 }
  0x2a   :  { %60 = vmax.xlane.f32.xlu0 %v59_v30  ;;  %v52_v30 = vld [vmem:[#allocation2] sm:$0x3] }
  0x2d   :  { %75 = vmax.xlane.f32.xlu1 %v74_v31 }
  0x2e   :  { %63 = vmax.xlane.f32.xlu0 %v62_v32 }
  0x9a   :  { %v152_v40 = vpop.xlane.xlu1 %151 }
  0x9b   :  { %v140_v41 = vpop.xlane.xlu0 %139  ;;  %v192_v57 = vrot.slane %v152_v40, %v89_v50 }
  0x9c   :  { %v173_v59 = vrot.slane %v140_v41, %v89_v50 }
  0x9e   :  { %v155_v45 = vpop.xlane.xlu1 %154 }
  0x9f   :  { %v143_v47 = vpop.xlane.xlu0 %142  ;;  %v196_v52 = vrot.slane %v155_v45, %v94_v46 }
  0xa0   :  { %v177_v55 = vrot.slane %v143_v47, %v94_v46 }
  0xa1   :  { %v197_v61 = vsel %vm96_vm2, %v196_v52, %v192_v57  ;;  %v520_v52 = vmov 1966171168  }
  0xa2   :  { %v158_v51 = vpop.xlane.xlu1 %157  ;;  %v178_v0 = vsel %vm96_vm2, %v177_v55, %v173_v59 }
  0xa3   :  { %v146_v53 = vpop.xlane.xlu0 %145  ;;  %v201_v56 = vrot.slane %v158_v51, %v101_v49 }
  0xa4   :  { %v182_v58 = vrot.slane %v146_v53, %v101_v49  ;;  %v389_v53 = vunpack.c.l.s4 %v520_v52 }
  0xa5   :  { %v202_v1 = vsel %vm103_vm3, %v201_v56, %v197_v61 }
  0xa6   :  { %v161_v60 = vpop.xlane.xlu1 %160  ;;  %v183_v3 = vsel %vm103_vm3, %v182_v58, %v178_v0 }
  0xa7   :  { %v206_v62 = vrot.slane %v161_v60, %v108_v54  ;;  %v149_v63 = vpop.xlane.xlu0 %148 }
  0xa8   :  { %v187_v2 = vrot.slane %v149_v63, %v108_v54 }
  0xa9   :  { %v207_v4 = vsel %vm110_vm4, %v206_v62, %v202_v1 }
  0xaa   :  { %v188_v6 = vsel %vm110_vm4, %v187_v2, %v183_v3  ;;  %v58_v7 = vpop.xlane.xlu1 %57 }
  0xab   :  { %v208_v8 = vsel %vm131_vm5, %v207_v4, %v188_v6  ;;  %v55_v9 = vpop.xlane.xlu0 %54  ;;  %v95_v17 = vrot.slane %v58_v7, %v94_v46 }
  0xac   :  { %v210_v10 = vadd.f32 %v208_v8, %v137_v5  ;;  %v90_v18 = vrot.slane %v55_v9, %v89_v50 }
  0xae   :  { %211 = vst.msk [vmem:[#allocation3] sm:$0x3] %vm33_vm0, %v210_v10  ;;  %v70_v11 = vpop.xlane.xlu1 %69  ;;  %v97_v25 = vsel %vm96_vm2, %v95_v17, %v90_v18 }
  0xaf   :  { %v67_v12 = vpop.xlane.xlu0 %66  ;;  %v119_v14 = vrot.slane %v70_v11, %v94_v46 }
  0xb0   :  { %v115_v15 = vrot.slane %v67_v12, %v89_v50 }
  0xb2   :  { %v73_v13 = vpop.xlane.xlu1 %72  ;;  %v120_v22 = vsel %vm96_vm2, %v119_v14, %v115_v15 }
  0xb3   :  { %v61_v16 = vpop.xlane.xlu0 %60  ;;  %v124_v19 = vrot.slane %v73_v13, %v101_v49 }
  0xb4   :  { %v102_v20 = vrot.slane %v61_v16, %v101_v49 }
  0xb5   :  { %v125_v26 = vsel %vm103_vm3, %v124_v19, %v120_v22  ;;  %v215_v34 = vld [vmem:[#allocation3] sm:$0x3] }
  0xb6   :  { %v76_v21 = vpop.xlane.xlu1 %75  ;;  %v104_v28 = vsel %vm103_vm3, %v102_v20, %v97_v25  ;;  %v216_v35 = vmul.f32 0.00390625, %v215_v34 }
  0xb7   :  { %v129_v23 = vrot.slane %v76_v21, %v108_v54  ;;  %v64_v24 = vpop.xlane.xlu0 %63 }
  0xb8   :  { %v109_v27 = vrot.slane %v64_v24, %v108_v54  ;;  %v219_v36 = vrot.slane %v216_v35, 6  ;;  %v390_v54 = vunpack.c.0.s8 %v389_v53 }
  0xb9   :  { %v130_v29 = vsel %vm110_vm4, %v129_v23, %v125_v26 }
  0xba   :  { %v111_v31 = vsel %vm110_vm4, %v109_v27, %v104_v28  ;;  %v393_v55 = vsub.s32 %v390_v54, %v561_v44 }
  0xbb   :  { %v132_v32 = vsel %vm131_vm5, %v130_v29, %v111_v31 }
  0xbc   :  { %v134_v33 = vmax.f32 %v52_v30, %v132_v32 }
  0xbe   :  { %136 = vst.msk [vmem:[#allocation2] sm:$0x3] %vm33_vm0, %v134_v33 }
  0xc5   :  { %v217_v37 = vld [vmem:[#allocation2] sm:$0x3] }
  0xc6   :  { %v222_v38 = vsel %vm221_vm6, %v217_v37, %v219_v36 }
  0xc7   :  { %450 = vmatmul.mubr.msk.f32.vlgmr.msra.gmra.mxu0 %vm227_vm7, %v222_v38 }
 0x187   :  { %v297_v40 = vpop.f32.mrf.mxu0 }
 0x188   :  { %v301_v41 = vmax.f32 %v297_v40, 0.0 }
 0x189   :  { %v451_v42 = vpop.f32.mrf.mxu0 }
 0x18a   :  { %455 = vmatmul.mubr.msk.f32.vlgmr.msra.gmra.mxu1 %vm303_vm8, %v301_v41 }
 0x24a   :  { %v373_v43 = vpop.f32.mrf.mxu1 }
 0x24b   :  { %v378_v45 = vrot.slane %v373_v43, 2 }
 0x24c   :  { %v456_v46 = vpop.f32.mrf.mxu1 }
 0x24d   :  { %v380_v47 = vadd.f32 %v378_v45, %v373_v43 }
 0x24f   :  { %v381_v48 = vsub.f32 0.0, %v380_v47 }
 0x251   :  { %v382_v49 = vmul.f32 1.442695, %v381_v48 }
 0x253   :  { %466 = vpow2.f32 %v382_v49 }
 0x260   :  { %v467_v50 = vpop.eup %466 }
 0x261   :  { %v384_v51 = vadd.f32 1.0, %v467_v50 }
 0x263   :  { %468 = vrcp.f32 %v384_v51 }
 0x270   :  { %v469_v56 = vpop.eup %468 }
 0x271   :  { %v394_v57 = vrot.slane %v469_v56, %v393_v55 }
 0x273   :  { %v395_v58 = vcombine.high %v394_v57, %v394_v57  ;;  %v402_v59 = vrot.slane %v394_v57, %v393_v55 }
 0x275   :  { %v409_v60 = vrot.slane %v395_v58, %v393_v55  ;;  %413 = vst.msk [vmem:[#allocation7] sm:$0x1] %vm412_vm9, %v402_v59 }
 0x277   :  { %414 = vst.msk [vmem:[#allocation7 + $0x1] sm:$0x1] %vm412_vm9, %v409_v60 }
 0x278   :  { %501 = shalt.err (!%p498_p9)
}
 0x279   :  { %s522_s29 = smov 1  }
 0x27a   :  { %426 = dma.vmem_to_hbm [thread:$0]  %s421_s27, 32, %s595_s3, [#allocation6], %s516_s16, %s516_s16, %s522_s29  }
 0x27b   :  { %512 = dma.done.wait [#allocation6], 32  }
 0x27c   :  { %513 = vsyncadd [#allocation6], 4294967264 }
 0x27d   :  { %430 = vsyncpa [#allocation5], 1 }
 0x27e   :  { %431 = vsyncpa [#allocation6], 1 }

</bundles_post_ra>
